<compile_context>
chip_gen: v7x
topology: tpu7x:2x2x1
jax: 0.10.0
libtpu: 0.0.40
codegen_flags: <defaults>
</compile_context>

<pallas_src>
import functools

import jax
import jax.numpy as jnp
from jax.experimental import pallas as pl
from jax.experimental.pallas import tpu as pltpu

_LANE = 128                       # lane width: block last dim, unmasked vst
_SUBLANE_LCM = 32                 # lcm of sublane tiles: 8 (f32) / 16 (bf16) / 32 (i8/fp8)
_VMEM_LIMIT = 32 * 1024 * 1024    # explicit scoped-VMEM: raises v5e's 16 MiB default


def _requ_kernel(x_ref, o_ref):
    # 0.5 * relu(x)^2 in f32, cast on store (bf16 I/O stays mem-bound-cheap
    # and accurate; v5e never does bf16 VALU math).
    x = x_ref[...].astype(jnp.float32)
    r = jnp.maximum(x, 0.0)
    o_ref[...] = (0.5 * r * r).astype(o_ref.dtype)


def _requ_jnp(x):
    # Plain-XLA fallback for the <128-element ragged tail / tiny inputs.
    r = jnp.maximum(x.astype(jnp.float32), 0.0)
    return (0.5 * r * r).astype(x.dtype)


@functools.lru_cache(maxsize=None)
def _on_v7x():
    # v7x has 2 TensorCores per chip with per-TC HBM bandwidth; engage both.
    try:
        return "7" in jax.devices()[0].device_kind.lower()
    except Exception:
        return False


def _requ_2d(x2d, *, block_rows, core_parallel, input_buffers):
    rows, lane = x2d.shape
    grid_steps = pl.cdiv(rows, block_rows)

    # Sweepable knob (review suggestion): deeper input pipelining. Default 2
    # keeps the maximally-compatible plain BlockSpec.
    in_spec_kwargs = {}
    if input_buffers != 2:
        in_spec_kwargs["pipeline_mode"] = pl.Buffered(input_buffers)

    if core_parallel and grid_steps >= 2:
        semantics = (pltpu.CORE_PARALLEL,)   # split row axis across v7x TCs
    else:
        semantics = (pltpu.PARALLEL,)

    return pl.pallas_call(
        _requ_kernel,
        out_shape=jax.ShapeDtypeStruct((rows, lane), x2d.dtype),
        grid_spec=pltpu.PrefetchScalarGridSpec(
            num_scalar_prefetch=0,
            grid=(grid_steps,),
            # cdiv grid: tile size is decoupled from row divisibility; the
            # ragged last block is masked by Pallas.
            in_specs=[pl.BlockSpec((block_rows, lane), lambda i: (i, 0),
                                   **in_spec_kwargs)],
            out_specs=pl.BlockSpec((block_rows, lane), lambda i: (i, 0)),
        ),
        compiler_params=pltpu.CompilerParams(
            dimension_semantics=semantics,
            vmem_limit_bytes=_VMEM_LIMIT,
        ),
    )(x2d)


@functools.partial(jax.jit, static_argnames=("block_bytes", "input_buffers"))
def requ(x, *, block_bytes=4 * 1024 * 1024, input_buffers=2):
    """ReQU: 0.5 * relu(x)**2, elementwise, any shape/float dtype.

    block_bytes=4 MiB per VMEM buffer (8192 f32 rows / 16384 bf16 rows):
    double-buffered in+out = 16 MiB, input_buffers=3 -> 20 MiB, both under
    the explicit 32 MiB scoped-VMEM limit on v5e/v6e/v7x.
    """
    orig_shape = x.shape
    n = x.size
    flat = x.reshape(-1)

    n_bulk = (n // _LANE) * _LANE
    if n_bulk == 0:
        # Less than one lane of data: not worth a kernel launch.
        return _requ_jnp(flat).reshape(orig_shape)

    itemsize = jnp.dtype(x.dtype).itemsize
    # ~block_bytes per buffer, rounded to a sublane multiple legal for
    # f32 / bf16 / int8 packings.
    block_rows = max(_SUBLANE_LCM,
                     (block_bytes // (_LANE * itemsize)) // _SUBLANE_LCM * _SUBLANE_LCM)
    rows = n_bulk // _LANE
    if rows <= block_rows:
        block_rows = rows  # full-extent block: always a legal block shape

    out_flat = _requ_2d(
        flat[:n_bulk].reshape(rows, _LANE),
        block_rows=block_rows,
        core_parallel=_on_v7x(),
        input_buffers=input_buffers,
    ).reshape(-1)

    if n_bulk != n:
        # <128-element ragged tail: tiny XLA epilogue instead of a
        # full-tensor pad (read+write input) + slice (read+write output).
        out_flat = jnp.concatenate([out_flat, _requ_jnp(flat[n_bulk:])])

    return out_flat.reshape(orig_shape)


if __name__ == "__main__":
    key = jax.random.PRNGKey(0)
    k0, k1, k2 = jax.random.split(key, 3)

    # Small 4-D activation tensor (batch=2, channels=4, spatial=16x16),
    # consistent with ReQU's typical use after a conv layer.
    x = jax.random.normal(k0, (2, 4, 16, 16), dtype=jnp.float32)
    out = jax.block_until_ready(requ(x))
    ref = 0.5 * jnp.maximum(x, 0.0) ** 2
    assert out.shape == x.shape and out.dtype == x.dtype
    assert jnp.allclose(out, ref, atol=1e-6, rtol=1e-6)

    # Lane-unaligned size (267 elements): bulk kernel + tiny XLA tail path.
    x2 = jax.random.normal(k1, (3, 89), dtype=jnp.float32)
    out2 = jax.block_until_ready(requ(x2))
    ref2 = 0.5 * jnp.maximum(x2, 0.0) ** 2
    assert out2.shape == x2.shape
    assert jnp.allclose(out2, ref2, atol=1e-6, rtol=1e-6)

    # bf16 input: dtype-aware tiling, f32 internal math, cast on store.
    x3 = jax.random.normal(k2, (2, 4, 16, 16), dtype=jnp.bfloat16)
    out3 = jax.block_until_ready(requ(x3))
    r3 = jnp.maximum(x3.astype(jnp.float32), 0.0)
    ref3 = (0.5 * r3 * r3).astype(jnp.bfloat16)
    assert out3.dtype == jnp.bfloat16
    assert jnp.allclose(out3.astype(jnp.float32), ref3.astype(jnp.float32),
                        atol=1e-2, rtol=1e-2)

    print("KERNEL_OK")
</pallas_src>

<mosaic_0001>
module attributes {stable_mosaic.version = 11 : i64} {
  func.func @_requ_kernel(%arg0: i32, %arg1: memref<16x128xf32, #tpu.memory_space<vmem>>, %arg2: memref<16x128xf32, #tpu.memory_space<vmem>>) attributes {dimension_semantics = [#tpu.dimension_semantics<parallel>], iteration_bounds = array<i64: 1>, scalar_prefetch = 0 : i64, scratch_operands = 0 : i64, tpu.core_type = #tpu.core_type<tc>, window_params = [{transform_indices = @transform_0, window_bounds = array<i64: 16, 128>}, {transform_indices = @transform_1, window_bounds = array<i64: 16, 128>}]} {
    %c0 = arith.constant 0 : index
    %c0_0 = arith.constant 0 : index
    %0 = vector.load %arg1[%c0, %c0_0] : memref<16x128xf32, #tpu.memory_space<vmem>>, vector<16x128xf32>
    %cst = arith.constant 0.000000e+00 : f32
    %1 = vector.broadcast %cst : f32 to vector<16x128xf32>
    %2 = arith.maximumf %0, %1 : vector<16x128xf32>
    %cst_1 = arith.constant 5.000000e-01 : f32
    %3 = vector.broadcast %cst_1 : f32 to vector<16x128xf32>
    %4 = arith.mulf %3, %2 : vector<16x128xf32>
    %5 = arith.mulf %4, %2 : vector<16x128xf32>
    %c0_2 = arith.constant 0 : index
    %c0_3 = arith.constant 0 : index
    %6 = vector.load %arg2[%c0_2, %c0_3] : memref<16x128xf32, #tpu.memory_space<vmem>>, vector<16x128xf32>
    tpu.vector_store %arg2[%c0_2, %c0_3], %5 {strides = array<i32>} : memref<16x128xf32, #tpu.memory_space<vmem>>, vector<16x128xf32>,
    return
  }
  func.func @transform_0(%arg0: i32) -> (i32, i32) {
    %c0_i32 = arith.constant 0 : i32
    %c0_i32_0 = arith.constant 0 : i32
    return %arg0, %c0_i32 : i32, i32
  }
  func.func @transform_1(%arg0: i32) -> (i32, i32) {
    %c0_i32 = arith.constant 0 : i32
    %c0_i32_0 = arith.constant 0 : i32
    return %arg0, %c0_i32 : i32, i32
  }
}

</mosaic_0001>

<bundles_post_ra>
// kernel: requ.1
= control target key start
LH: loop header
LB: loop body
LE: loop exit
PB: predicated region body
PF: predicated region fallthrough
CT: control target
= control target key end

     0   :  { %s44_s0 = inlined_call_operand.vmem [shape: f32[16,128], index: 0, kind: input, shape index: {}]   ;;  %s45_s1 = inlined_call_operand.vmem [shape: f32[16,128], index: 1, kind: output, shape index: {}]  }
   0x1   :  { %v8_v0 = vld [vmem:[%s44_s0] sm:$0xff]  ;;  %v9_v1 = vld [vmem:[%s44_s0 + $0x8] sm:$0xff] }
   0x2   :  { %v10_v2 = vmax.f32 %v8_v0, 0.0  ;;  %v11_v3 = vmax.f32 %v9_v1, 0.0 }
   0x4   :  { %v12_v4 = vmul.f32 0.5, %v10_v2  ;;  %v13_v5 = vmul.f32 0.5, %v11_v3 }
   0x6   :  { %v14_v6 = vmul.f32 %v12_v4, %v10_v2  ;;  %v15_v7 = vmul.f32 %v13_v5, %v11_v3 }
   0x8   :  { %16 = vst [vmem:[%s45_s1] sm:$0xff] %v14_v6  ;;  %17 = vst [vmem:[%s45_s1 + $0x8] sm:$0xff] %v15_v7 }

</bundles_post_ra>
